<compile_context>
chip_gen: v5e
topology: v5e:2x2
jax: 0.10.0
libtpu: 0.0.40
codegen_flags: <defaults>
</compile_context>

<pallas_src>
import functools
import math

import numpy as np
import jax
import jax.numpy as jnp
from jax.experimental import pallas as pl
from jax.experimental.pallas import tpu as pltpu

# ----------------- scaled-down hyper-parameters (full-size in comments) -----
N_BATCH   = 2
IMG       = 32      # input spatial size (real model: ~416x544)
FEATURES  = 128     # DecoderBN num_features / bottleneck_features (real: 2048)
C_DEC_OUT = 32      # decoder num_classes == mViT in_channels (real: 128)
EMB       = 32      # mViT embedding_dim (real: 128)
N_QUERY   = 16      # mViT n_query_channels (real: 128)
PATCH     = 2       # mViT patch_size (real: 16)
N_BINS    = 16      # n_bins (real: 100)
N_HEADS   = 4
FFN_DIM   = 64      # transformer dim_feedforward (real: 1024)
REG_HID   = 64      # regressor hidden (real: 256)
N_LAYERS  = 4
MIN_VAL   = 0.1
MAX_VAL   = 10.0
LEAKY     = 0.01    # nn.LeakyReLU default slope


def _vmem_limit_bytes():
    # Generation-aware scoped-VMEM limit: ~3/4 of physical capacity
    # (~96 MiB on v5e/v6e's 128 MiB, ~48 MiB on v7x's 64 MiB per TC).
    try:
        cap = int(pltpu.get_tpu_info().vmem_capacity_bytes)
        return int(min(max(cap * 3 // 4, 32 * 1024 * 1024), 112 * 1024 * 1024))
    except Exception:
        return 48 * 1024 * 1024


VMEM_LIMIT = _vmem_limit_bytes()


# ============================ helpers =======================================

def _round_up(x, m):
    return (x + m - 1) // m * m


def _pick_tile(dim, max_tile, align):
    """Return (padded_dim, tile).  Full-extent block (no padding) when the dim
    is small; otherwise prefer an aligned tile that divides the *unpadded* dim
    (avoids wrapper-side pad/slice HBM passes), falling back to minimal
    alignment padding."""
    if dim <= max_tile:
        return dim, dim
    hi = max_tile - max_tile % align
    for t in range(hi, align - 1, -align):
        if dim % t == 0:
            return dim, t
    p = _round_up(dim, align)
    for t in range(hi, align - 1, -align):
        if p % t == 0:
            return p, t
    return p, align


def _apply_act(r, act):
    if act == 'relu':
        return jnp.maximum(r, 0.0)
    if act == 'leaky_relu':
        return jnp.where(r >= 0, r, LEAKY * r)
    return r


# ============================ Pallas kernels ================================

def _matmul_kernel(a_ref, b_ref, bias_ref, o_ref, acc_ref, *, nk, act):
    # grid = (B, m, n, k); k innermost ("arbitrary").  f32 accumulation lives in
    # a VMEM scratch; operands are cast to bf16 per-tile here (not in the
    # wrapper), and the output block is emitted once, in o_ref.dtype.
    k = pl.program_id(3)

    @pl.when(k == 0)
    def _():
        acc_ref[...] = jnp.zeros_like(acc_ref)

    acc_ref[...] += jnp.dot(a_ref[0].astype(jnp.bfloat16),
                            b_ref[0].astype(jnp.bfloat16),
                            preferred_element_type=jnp.float32)

    @pl.when(k == nk - 1)
    def _():
        r = acc_ref[...] + bias_ref[0]
        o_ref[0] = _apply_act(r, act).astype(o_ref.dtype)


def pallas_matmul(a, b, bias=None, act='none', out_dtype=jnp.float32,
                  tm_max=256, tk_max=512, tn_max=256):
    """out = act(a @ b + bias).
    a: (M,K) or (B,M,K); b: (K,N) or (B,K,N).  2-D operands are shared across
    the batch via block index 0 (never broadcast/materialized).  Operands keep
    their HBM dtype (f32 or bf16) and are cast to bf16 inside the kernel;
    accumulation is f32; the output dtype is `out_dtype`."""
    squeeze = (a.ndim == 2 and b.ndim == 2)
    a3 = a if a.ndim == 3 else a[None]
    b3 = b if b.ndim == 3 else b[None]
    Ba, M, K = a3.shape
    Bb, Kb, N = b3.shape
    assert K == Kb, (a3.shape, b3.shape)
    assert Ba == Bb or Ba == 1 or Bb == 1, (Ba, Bb)
    B = max(Ba, Bb)

    Mp, tm = _pick_tile(M, tm_max, 16)     # 16-row alignment for bf16 packing
    Kp, tk = _pick_tile(K, tk_max, 128)
    Np, tn = _pick_tile(N, tn_max, 128)

    if (Mp, Kp) != (M, K):
        a3 = jnp.pad(a3, ((0, 0), (0, Mp - M), (0, Kp - K)))
    if (Kp, Np) != (K, N):
        b3 = jnp.pad(b3, ((0, 0), (0, Kp - K), (0, Np - N)))
    if bias is None:
        bias_p = jnp.zeros((1, 1, Np), jnp.float32)
    else:
        bias_p = bias.astype(jnp.float32).reshape(1, 1, N)
        if Np != N:
            bias_p = jnp.pad(bias_p, ((0, 0), (0, 0), (0, Np - N)))

    nm, nn, nk = Mp // tm, Np // tn, Kp // tk
    a_idx = (lambda bb, mi, ni, ki: (bb, mi, ki)) if Ba > 1 else \
            (lambda bb, mi, ni, ki: (0, mi, ki))
    b_idx = (lambda bb, mi, ni, ki: (bb, ki, ni)) if Bb > 1 else \
            (lambda bb, mi, ni, ki: (0, ki, ni))

    out = pl.pallas_call(
        functools.partial(_matmul_kernel, nk=nk, act=act),
        out_shape=jax.ShapeDtypeStruct((B, Mp, Np), out_dtype),
        grid=(B, nm, nn, nk),
        in_specs=[
            pl.BlockSpec((1, tm, tk), a_idx),
            pl.BlockSpec((1, tk, tn), b_idx),
            pl.BlockSpec((1, 1, tn), lambda bb, mi, ni, ki: (0, 0, ni)),
        ],
        out_specs=pl.BlockSpec((1, tm, tn), lambda bb, mi, ni, ki: (bb, mi, ni)),
        scratch_shapes=[pltpu.VMEM((tm, tn), jnp.float32)],
        compiler_params=pltpu.CompilerParams(
            dimension_semantics=("parallel", "parallel", "parallel", "arbitrary"),
            vmem_limit_bytes=VMEM_LIMIT),
    )(a3, b3, bias_p)
    if (Mp, Np) != (M, N):
        out = out[:, :M, :N]
    return out[0] if squeeze else out


# ---- direct (no-im2col) conv for stride-1 convs -----------------------------
# The padded input is flattened to (Hp*Wp, Cin) per image (a free view); each
# kernel tap (ki,kj) is a contiguous slice shifted by ki*Wp+kj, so the KxK conv
# is kh*kw MXU matmuls accumulated in-register.  Output is produced at padded
# width Wp and cropped.  Outputs are bf16, bias+LeakyReLU fused as epilogue.
# TODO(synk): at real AdaBins resolutions the per-image block should be H-tiled
# with a manual halo DMA (memory_space=pl.ANY + make_async_copy), and the kj
# column shifts done with pltpu.roll on a Wp%8==0 slab to avoid misaligned
# bf16 slices.

def _conv_direct_kernel(x_ref, w_ref, b_ref, o_ref, *, taps, Wp, Mrows, act):
    tco = o_ref.shape[-1]
    acc = jnp.zeros((Mrows, tco), jnp.float32)
    for t, (ki, kj) in enumerate(taps):
        s = ki * Wp + kj
        acc = acc + jnp.dot(x_ref[0, s:s + Mrows, :], w_ref[t],
                            preferred_element_type=jnp.float32)
    o_ref[0] = _apply_act(acc + b_ref[...], act).astype(o_ref.dtype)


def conv2d_direct(p, x, pad, act):
    w, b = p['w'], p['b']                       # w: (kh, kw, cin, cout) HWIO
    kh, kw, cin, cout = w.shape
    N, H, W, C = x.shape
    Ho = H + 2 * pad - kh + 1
    Wo = W + 2 * pad - kw + 1
    Hp, Wp = H + 2 * pad, W + 2 * pad
    extra = 1 if kw > 1 else 0                  # covers the (kw-1) flat-row overshoot
    xp = jnp.pad(x, ((0, 0), (pad, pad + extra), (pad, pad), (0, 0)))
    F = (Hp + extra) * Wp
    xf = xp.reshape(N, F, C)
    if xf.dtype != jnp.bfloat16:
        xf = xf.astype(jnp.bfloat16)            # only triggers on the raw image / stem

    Mrows = Ho * Wp
    taps = [(ki, kj) for ki in range(kh) for kj in range(kw)]
    wt = w.reshape(kh * kw, cin, cout).astype(jnp.bfloat16)

    if cout <= 512:
        Cop, tco = cout, cout
    else:
        Cop, tco = _round_up(cout, 128), 128
        wt = jnp.pad(wt, ((0, 0), (0, 0), (0, Cop - cout)))
    bp = jnp.pad(b.astype(jnp.float32), (0, Cop - cout)).reshape(1, Cop)
    nco = Cop // tco

    out = pl.pallas_call(
        functools.partial(_conv_direct_kernel, taps=taps, Wp=Wp, Mrows=Mrows, act=act),
        out_shape=jax.ShapeDtypeStruct((N, Mrows, Cop), jnp.bfloat16),
        grid=(N, nco),
        in_specs=[
            pl.BlockSpec((1, F, C), lambda n, co: (n, 0, 0)),
            pl.BlockSpec((kh * kw, cin, tco), lambda n, co: (0, 0, co)),
            pl.BlockSpec((1, tco), lambda n, co: (0, co)),
        ],
        out_specs=pl.BlockSpec((1, Mrows, tco), lambda n, co: (n, 0, co)),
        compiler_params=pltpu.CompilerParams(
            dimension_semantics=("parallel", "parallel"),
            vmem_limit_bytes=VMEM_LIMIT),
    )(xf, wt, bp)
    return out.reshape(N, Ho, Wp, Cop)[:, :, :Wo, :cout]


# ---- row-tiled elementwise kernels ------------------------------------------

def _affine_act_kernel(x_ref, s_ref, t_ref, o_ref, *, act):
    o_ref[...] = _apply_act(x_ref[...] * s_ref[...] + t_ref[...], act).astype(o_ref.dtype)


def pallas_affine_act(x2d, scale, shift, act='leaky_relu'):
    # Only used by the synthetic encoder stem; decoder BN is folded into convs.
    R, C = x2d.shape
    Rp, tr = _pick_tile(R, 4096, 8)
    xp = x2d if Rp == R else jnp.pad(x2d, ((0, Rp - R), (0, 0)))
    out = pl.pallas_call(
        functools.partial(_affine_act_kernel, act=act),
        out_shape=jax.ShapeDtypeStruct((Rp, C), x2d.dtype),
        grid=(Rp // tr,),
        in_specs=[pl.BlockSpec((tr, C), lambda i: (i, 0)),
                  pl.BlockSpec((1, C), lambda i: (0, 0)),
                  pl.BlockSpec((1, C), lambda i: (0, 0))],
        out_specs=pl.BlockSpec((tr, C), lambda i: (i, 0)),
        compiler_params=pltpu.CompilerParams(
            dimension_semantics=("parallel",), vmem_limit_bytes=VMEM_LIMIT),
    )(xp, scale.reshape(1, C), shift.reshape(1, C))
    return out if Rp == R else out[:R]


def _layernorm_kernel(x_ref, r_ref, g_ref, b_ref, o_ref):
    v = x_ref[...] + r_ref[...]
    mu = jnp.mean(v, axis=-1, keepdims=True)
    var = jnp.mean((v - mu) ** 2, axis=-1, keepdims=True)
    o_ref[...] = ((v - mu) * jax.lax.rsqrt(var + 1e-5) * g_ref[...]
                  + b_ref[...]).astype(o_ref.dtype)


def pallas_layernorm_residual(x2d, res2d, gamma, beta):
    R, C = x2d.shape
    Rp, tr = _pick_tile(R, 2048, 8)
    xp = x2d if Rp == R else jnp.pad(x2d, ((0, Rp - R), (0, 0)))
    rp = res2d if Rp == R else jnp.pad(res2d, ((0, Rp - R), (0, 0)))
    out = pl.pallas_call(
        _layernorm_kernel,
        out_shape=jax.ShapeDtypeStruct((Rp, C), jnp.float32),
        grid=(Rp // tr,),
        in_specs=[pl.BlockSpec((tr, C), lambda i: (i, 0)),
                  pl.BlockSpec((tr, C), lambda i: (i, 0)),
                  pl.BlockSpec((1, C), lambda i: (0, 0)),
                  pl.BlockSpec((1, C), lambda i: (0, 0))],
        out_specs=pl.BlockSpec((tr, C), lambda i: (i, 0)),
        compiler_params=pltpu.CompilerParams(
            dimension_semantics=("parallel",), vmem_limit_bytes=VMEM_LIMIT),
    )(xp, rp, gamma.reshape(1, C), beta.reshape(1, C))
    return out if Rp == R else out[:R]


# ---- fused attention (scores + softmax + ctx in one kernel) ------------------

def _attn_kernel(q_ref, k_ref, v_ref, o_ref):
    q = q_ref[0].astype(jnp.bfloat16)
    k = k_ref[0].astype(jnp.bfloat16)
    # scores = q @ k^T (contraction on the last dim of both - no XLA transpose)
    s = jax.lax.dot_general(q, k, (((1,), (1,)), ((), ())),
                            preferred_element_type=jnp.float32)          # (S, S)
    m = jnp.max(s, axis=-1, keepdims=True)
    e = jnp.exp(s - m)
    p = e / jnp.sum(e, axis=-1, keepdims=True)
    ctx = jnp.dot(p.astype(jnp.bfloat16), v_ref[0].astype(jnp.bfloat16),
                  preferred_element_type=jnp.float32)                    # (S, dh)
    o_ref[0] = ctx.astype(o_ref.dtype)


def fused_attention(q, k, v):
    """q,k,v: (B*H, S, dh) with the 1/sqrt(dh) scale already folded into q."""
    BH, S, dh = q.shape
    return pl.pallas_call(
        _attn_kernel,
        out_shape=jax.ShapeDtypeStruct((BH, S, dh), jnp.float32),
        grid=(BH,),
        in_specs=[pl.BlockSpec((1, S, dh), lambda b: (b, 0, 0)),
                  pl.BlockSpec((1, S, dh), lambda b: (b, 0, 0)),
                  pl.BlockSpec((1, S, dh), lambda b: (b, 0, 0))],
        out_specs=pl.BlockSpec((1, S, dh), lambda b: (b, 0, 0)),
        compiler_params=pltpu.CompilerParams(
            dimension_semantics=("parallel",), vmem_limit_bytes=VMEM_LIMIT),
    )(q, k, v)


# ---- fused process_Rb (conv_out 1x1 + softmax(dim=1) + center-weighted sum) --
# Output is lane-dense: the per-pixel prediction row (1, tile_hw) is produced by
# contracting [centers; ones] (2, n_bins) against exp(logits) (tile_hw, n_bins)
# on the MXU, so no lane-width-1 masked stores.

def _rb_kernel(x_ref, w_ref, b_ref, cw_ref, o_ref):
    logits = jnp.dot(x_ref[0].astype(jnp.bfloat16), w_ref[...].astype(jnp.bfloat16),
                     preferred_element_type=jnp.float32) + b_ref[...]     # (thw, nb)
    m = jnp.max(logits, axis=-1, keepdims=True)
    e = jnp.exp(logits - m)
    nd = jax.lax.dot_general(cw_ref[0], e, (((1,), (1,)), ((), ())),
                             preferred_element_type=jnp.float32)          # (2, thw)
    o_ref[0] = nd[0:1] / nd[1:2]


def pallas_process_rb(R4, w, b, centers):
    """R4: (N, H, W, NQ) range-attention maps, centers: (N, n_bins) -> (N,1,H,W)."""
    N, H, W, NQ = R4.shape
    nb = w.shape[1]
    HW = H * W
    HWp, thw = _pick_tile(HW, 2048, 128)
    xf = R4.reshape(N, HW, NQ)
    if HWp != HW:
        xf = jnp.pad(xf, ((0, 0), (0, HWp - HW), (0, 0)))
    cw = jnp.stack([centers.astype(jnp.float32),
                    jnp.ones_like(centers, jnp.float32)], axis=1)         # (N, 2, nb)
    out = pl.pallas_call(
        _rb_kernel,
        out_shape=jax.ShapeDtypeStruct((N, 1, HWp), jnp.float32),
        grid=(N, HWp // thw),
        in_specs=[pl.BlockSpec((1, thw, NQ), lambda n, i: (n, i, 0)),
                  pl.BlockSpec((NQ, nb), lambda n, i: (0, 0)),
                  pl.BlockSpec((1, nb), lambda n, i: (0, 0)),
                  pl.BlockSpec((1, 2, nb), lambda n, i: (n, 0, 0))],
        out_specs=pl.BlockSpec((1, 1, thw), lambda n, i: (n, 0, i)),
        compiler_params=pltpu.CompilerParams(
            dimension_semantics=("parallel", "parallel"),
            vmem_limit_bytes=VMEM_LIMIT),
    )(xf, w, b.reshape(1, nb), cw)
    pred = out[:, 0, :HW] if HWp != HW else out[:, 0, :]
    return pred.reshape(N, 1, H, W)


# ============================ layer wrappers ================================

def im2col(x, kh, kw, stride, pad):
    N, H, W, C = x.shape
    xp = jnp.pad(x, ((0, 0), (pad, pad), (pad, pad), (0, 0)))
    Ho = (H + 2 * pad - kh) // stride + 1
    Wo = (W + 2 * pad - kw) // stride + 1
    cols = []
    for i in range(kh):
        for j in range(kw):
            cols.append(xp[:, i:i + stride * (Ho - 1) + 1:stride,
                           j:j + stride * (Wo - 1) + 1:stride, :])
    cols = jnp.concatenate(cols, axis=-1)          # (N, Ho, Wo, kh*kw*C)
    return cols.reshape(N * Ho * Wo, kh * kw * C), N, Ho, Wo


def patchify_conv(p, x, patch, act='none'):
    # kernel == stride, pad == 0: non-overlapping patches -> free reshape + one matmul
    w, b = p['w'], p['b']
    N, H, W, C = x.shape
    hp, wp = H // patch, W // patch
    xr = x.reshape(N, hp, patch, wp, patch, C).transpose(0, 1, 3, 2, 4, 5)
    xr = xr.reshape(N, hp * wp, patch * patch * C)
    y = pallas_matmul(xr, w.reshape(patch * patch * C, -1), bias=b, act=act)
    return y.reshape(N, hp, wp, -1)


def conv2d(p, x, stride=1, pad=0, act='none'):
    # weights stored HWIO (== PyTorch OIHW permuted to (kh, kw, cin, cout))
    kh, kw, cin, cout = p['w'].shape
    if stride == 1:
        return conv2d_direct(p, x, pad, act)
    if stride == kh == kw and pad == 0:
        return patchify_conv(p, x, stride, act=act)
    # TODO(synk): strided convs only occur in the synthetic EfficientNet stand-in
    # encoder; they keep an (bf16) im2col + matmul fallback.
    if x.dtype != jnp.bfloat16:
        x = x.astype(jnp.bfloat16)
    cols, N, Ho, Wo = im2col(x, kh, kw, stride, pad)
    y = pallas_matmul(cols, p['w'].reshape(kh * kw * cin, cout), bias=p['b'],
                      act=act, out_dtype=jnp.bfloat16)
    return y.reshape(N, Ho, Wo, cout)


def bn_leaky(p, x, act='leaky_relu'):
    # eval-mode BatchNorm2d folded to channel affine, fused with LeakyReLU
    # (only used in the synthetic encoder stem; decoder BN is folded into convs)
    scale = p['gamma'] * jax.lax.rsqrt(p['var'] + 1e-5)
    shift = p['beta'] - p['mean'] * scale
    N, H, W, C = x.shape
    y = pallas_affine_act(x.reshape(N * H * W, C), scale, shift, act=act)
    return y.reshape(N, H, W, C)


def _interp_matrix(n_in, n_out):
    A = np.zeros((n_out, n_in), np.float32)
    if n_in == 1:
        A[:, 0] = 1.0
        return jnp.asarray(A)
    if n_out == 1:
        A[0, 0] = 1.0
        return jnp.asarray(A)
    src = np.arange(n_out) * (n_in - 1) / (n_out - 1)
    lo = np.clip(np.floor(src).astype(np.int64), 0, n_in - 1)
    hi = np.minimum(lo + 1, n_in - 1)
    w = (src - lo).astype(np.float32)
    A[np.arange(n_out), lo] += 1.0 - w
    A[np.arange(n_out), hi] += w
    return jnp.asarray(A)


def bilinear_resize(x, Ho, Wo):
    # F.interpolate(mode='bilinear', align_corners=True) as two Pallas matmuls.
    # Channels stay on the lane axis throughout (no transposes, lane-dense stores).
    N, H, W, C = x.shape
    Ah = _interp_matrix(H, Ho)                                  # (Ho, H)
    Aw = _interp_matrix(W, Wo)                                  # (Wo, W)
    t = pallas_matmul(Ah, x.reshape(N, H, W * C), out_dtype=jnp.bfloat16)
    t = pallas_matmul(Aw, t.reshape(N * Ho, W, C), out_dtype=jnp.bfloat16)
    return t.reshape(N, Ho, Wo, C)


# ============================ model pieces ==================================

def encoder_forward(p, x):
    # TODO(synk): tf_efficientnet_b5_ap backbone (torch.hub) is not reproducible
    # here; synthetic conv encoder with matching feature indices/channels/strides.
    feats = [x]
    h = conv2d(p['conv_stem'], x, stride=2, pad=1); feats.append(h)      # [1]
    h = bn_leaky(p['bn1'], h); feats.append(h)                           # [2]
    h = bn_leaky(p['act1'], h); feats.append(h)                          # [3]
    for cp, st in zip(p['blocks'], p['block_strides']):                  # [4..10]
        h = conv2d(cp, h, stride=st, pad=1, act='leaky_relu'); feats.append(h)
    h = conv2d(p['conv_head'], h, stride=1, pad=0, act='leaky_relu')     # [11]
    feats.append(h)
    return feats


def upsample_bn(p, x, concat_with):
    # Conv -> BN -> LeakyReLU twice; BN is folded into the conv weights, so each
    # step is a single Pallas conv with a LeakyReLU epilogue.
    Ht, Wt = concat_with.shape[1], concat_with.shape[2]
    up_x = bilinear_resize(x, Ht, Wt)
    f = jnp.concatenate([up_x, concat_with], axis=-1)   # cat dim=1 in NCHW == channel-last here
    h = conv2d(p['conv1'], f, stride=1, pad=1, act='leaky_relu')
    h = conv2d(p['conv2'], h, stride=1, pad=1, act='leaky_relu')
    return h


def decoder_forward(p, feats):
    xb0, xb1, xb2, xb3, xb4 = feats[4], feats[5], feats[6], feats[8], feats[11]
    # conv2 is a 1x1 kernel with padding=1 (spatial grows by 2) - matches the
    # PyTorch reference module exactly (known quirk of DecoderBN).
    x_d0 = conv2d(p['conv2'], xb4, stride=1, pad=1)
    x_d1 = upsample_bn(p['up1'], x_d0, xb3)
    x_d2 = upsample_bn(p['up2'], x_d1, xb2)
    x_d3 = upsample_bn(p['up3'], x_d2, xb1)
    x_d4 = upsample_bn(p['up4'], x_d3, xb0)
    return conv2d(p['conv3'], x_d4, stride=1, pad=1)


def multi_head_attention(p, src):
    S, Nb, E = src.shape
    h, dh = N_HEADS, E // N_HEADS
    scale = 1.0 / math.sqrt(dh)
    # fold the 1/sqrt(dh) query scaling into the input projection (weights are tiny)
    w_in = jnp.concatenate([p['in_proj']['w'][:, :E] * scale,
                            p['in_proj']['w'][:, E:]], axis=1)
    b_in = jnp.concatenate([p['in_proj']['b'][:E] * scale,
                            p['in_proj']['b'][E:]], axis=0)
    x2 = src.reshape(S * Nb, E)
    qkv = pallas_matmul(x2, w_in, bias=b_in)
    q, k, v = jnp.split(qkv, 3, axis=-1)

    def to_heads(t):
        return t.reshape(S, Nb, h, dh).transpose(1, 2, 0, 3).reshape(Nb * h, S, dh)

    ctx = fused_attention(to_heads(q), to_heads(k), to_heads(v))         # (Nb*h, S, dh)
    ctx = ctx.reshape(Nb, h, S, dh).transpose(2, 0, 1, 3).reshape(S * Nb, E)
    out = pallas_matmul(ctx, p['out_proj']['w'], bias=p['out_proj']['b'])
    return out.reshape(S, Nb, E)


def transformer_layer(p, src):
    # nn.TransformerEncoderLayer defaults: post-LayerNorm, ReLU FFN, dropout=identity (eval)
    S, Nb, E = src.shape
    a = multi_head_attention(p, src)
    x = pallas_layernorm_residual(a.reshape(S * Nb, E), src.reshape(S * Nb, E),
                                  p['ln1']['gamma'], p['ln1']['beta'])
    f = pallas_matmul(x, p['ff1']['w'], bias=p['ff1']['b'], act='relu')
    f = pallas_matmul(f, p['ff2']['w'], bias=p['ff2']['b'])
    x = pallas_layernorm_residual(f, x, p['ln2']['gamma'], p['ln2']['beta'])
    return x.reshape(S, Nb, E)


def mvit_forward(p, x):
    # x: (N, H, W, C_DEC_OUT); returns D, queries, tgt_rest, bin_widths_normed, R
    N, H, W, _ = x.shape
    emb = conv2d(p['embed_conv'], x, stride=PATCH, pad=0)                # patchify matmul
    S = emb.shape[1] * emb.shape[2]
    emb = emb.reshape(N, S, EMB) + p['pos_enc'][:S][None]                # + positional encodings
    tgt = emb.transpose(1, 0, 2)                                         # (S, N, E)
    for lp in p['layers']:
        tgt = transformer_layer(lp, tgt)

    x_conv = conv2d(p['conv3x3'], x, stride=1, pad=1)                    # (N, H, W, EMB) bf16
    head = tgt[0]                                                        # (N, E)
    queries = tgt[1:N_QUERY + 1].transpose(1, 0, 2)                      # (N, NQ, E)
    tgt_rest = tgt[N_QUERY + 1:]                                         # (S-NQ-1, N, E)

    # PixelWiseDotProduct
    R = pallas_matmul(x_conv.reshape(N, H * W, EMB), queries.transpose(0, 2, 1),
                      out_dtype=jnp.bfloat16)
    R = R.reshape(N, H, W, N_QUERY)                                      # == (N, NQ, H, W) NCHW

    y = pallas_matmul(head, p['reg1']['w'], bias=p['reg1']['b'], act='leaky_relu')
    y = pallas_matmul(y, p['reg2']['w'], bias=p['reg2']['b'], act='leaky_relu')
    y = pallas_matmul(y, p['reg3']['w'], bias=p['reg3']['b'])
    # norm == 'linear'
    y = jnp.maximum(y, 0.0) + 0.1
    y = y / jnp.sum(y, axis=1, keepdims=True)

    # TODO(synk): the modified mViT returning D/queries/tgt_rest is not provided in the
    # prompt; D is taken to be the conv3x3 feature map per the AdaBins reference code.
    D = x_conv
    return D, queries, tgt_rest, y, R


def unet_adaptive_bins_forward(params, x_nchw):
    x = jnp.transpose(x_nchw, (0, 2, 3, 1)).astype(jnp.float32)          # NCHW -> NHWC
    feats = encoder_forward(params['encoder'], x)
    unet_out = decoder_forward(params['decoder'], feats)                 # (N, H/2, W/2, C_DEC_OUT)
    D, queries, tgt_rest, bw_normed, R = mvit_forward(params['mvit'], unet_out)

    bin_widths = (MAX_VAL - MIN_VAL) * bw_normed                         # (N, n_bins)
    bin_widths = jnp.pad(bin_widths, ((0, 0), (1, 0)), constant_values=MIN_VAL)
    bin_edges = jnp.cumsum(bin_widths, axis=1)
    centers = 0.5 * (bin_edges[:, :-1] + bin_edges[:, 1:])               # (N, n_bins)

    # process_Rb fused across the batch in one Pallas call (lane-dense output)
    pred = pallas_process_rb(R, params['conv_out']['w'],
                             params['conv_out']['b'], centers)           # (N, 1, H/2, W/2)
    return centers, pred


# ============================ parameters ====================================

class ParamGen:
    def __init__(self, key):
        self.key = key
        self.count = 0

    def normal(self, shape, scale):
        self.count += 1
        k = jax.random.fold_in(self.key, self.count)
        return scale * jax.random.normal(k, shape, dtype=jnp.float32)

    def conv(self, kh, kw, cin, cout):
        return {'w': self.normal((kh, kw, cin, cout), 1.0 / math.sqrt(kh * kw * cin)),
                'b': self.normal((cout,), 0.01)}

    def linear(self, cin, cout):
        return {'w': self.normal((cin, cout), 1.0 / math.sqrt(cin)),
                'b': self.normal((cout,), 0.01)}

    def bn(self, c):
        return {'gamma': 1.0 + self.normal((c,), 0.1),
                'beta': self.normal((c,), 0.1),
                'mean': self.normal((c,), 0.1),
                'var': 1.0 + jnp.abs(self.normal((c,), 0.1))}

    def ln(self, c):
        return {'gamma': 1.0 + self.normal((c,), 0.1),
                'beta': self.normal((c,), 0.1)}


def fold_bn(conv, bn, eps=1e-5):
    # eval-mode Conv -> BN folded into a single conv (weights HWIO, scale on cout)
    scale = bn['gamma'] * jax.lax.rsqrt(bn['var'] + eps)
    return {'w': conv['w'] * scale,
            'b': (conv['b'] - bn['mean']) * scale + bn['beta']}


def build_params(key):
    g = ParamGen(key)
    p = {}
    # synthetic encoder (stands in for the EfficientNet-B5 backbone)
    enc = {'conv_stem': g.conv(3, 3, 3, 16), 'bn1': g.bn(16), 'act1': g.bn(16)}
    block_defs = [(16, 24, 1), (24, 40, 2), (40, 64, 2), (64, 128, 2),
                  (128, 176, 1), (176, 256, 2), (256, 256, 1)]
    enc['blocks'] = [g.conv(3, 3, ci, co) for ci, co, _ in block_defs]
    enc['block_strides'] = [s for _, _, s in block_defs]
    enc['conv_head'] = g.conv(1, 1, 256, FEATURES)
    p['encoder'] = enc

    # DecoderBN (hard-coded skip-channel sums from the PyTorch module);
    # BatchNorm folded into the convs at build time.
    f = FEATURES

    def up(skip_c, out_c):
        return {'conv1': fold_bn(g.conv(3, 3, skip_c, out_c), g.bn(out_c)),
                'conv2': fold_bn(g.conv(3, 3, out_c, out_c), g.bn(out_c))}

    dec = {'conv2': g.conv(1, 1, f, f),
           'up1': up(f // 1 + 112 + 64, f // 2),
           'up2': up(f // 2 + 40 + 24, f // 4),
           'up3': up(f // 4 + 24 + 16, f // 8),
           'up4': up(f // 8 + 16 + 8, f // 16),
           'conv3': g.conv(3, 3, f // 16, C_DEC_OUT)}
    p['decoder'] = dec

    # mViT
    mv = {'embed_conv': g.conv(PATCH, PATCH, C_DEC_OUT, EMB),
          'pos_enc': jax.random.uniform(jax.random.fold_in(key, 9999), (500, EMB), jnp.float32),
          'conv3x3': g.conv(3, 3, C_DEC_OUT, EMB),
          'reg1': g.linear(EMB, REG_HID),
          'reg2': g.linear(REG_HID, REG_HID),
          'reg3': g.linear(REG_HID, N_BINS),
          'layers': []}
    for _ in range(N_LAYERS):
        mv['layers'].append({'in_proj': g.linear(EMB, 3 * EMB),
                             'out_proj': g.linear(EMB, EMB),
                             'ln1': g.ln(EMB),
                             'ff1': g.linear(EMB, FFN_DIM),
                             'ff2': g.linear(FFN_DIM, EMB),
                             'ln2': g.ln(EMB)})
    p['mvit'] = mv

    # conv_out: 1x1 conv over the range-attention-map channels
    p['conv_out'] = g.linear(N_QUERY, N_BINS)
    return p


# ============================ main ==========================================

if __name__ == "__main__":
    key = jax.random.PRNGKey(0)
    params = build_params(jax.random.fold_in(key, 1))
    x = jax.random.normal(jax.random.fold_in(key, 2),
                          (N_BATCH, 3, IMG, IMG), jnp.float32)   # NCHW like PyTorch

    centers, pred = unet_adaptive_bins_forward(params, x)
    centers = jax.block_until_ready(centers)
    pred = jax.block_until_ready(pred)

    assert centers.shape == (N_BATCH, N_BINS), centers.shape
    assert pred.shape == (N_BATCH, 1, IMG // 2, IMG // 2), pred.shape
    assert bool(jnp.isfinite(centers).all()) and bool(jnp.isfinite(pred).all())
    print("KERNEL_OK")
</pallas_src>

<mosaic_0001>
module attributes {stable_mosaic.version = 11 : i64} {
  func.func @_matmul_kernel(%arg0: i32, %arg1: i32, %arg2: i32, %arg3: i32, %arg4: memref<1x256x27xbf16, #tpu.memory_space<vmem>>, %arg5: memref<1x27x16xf32, #tpu.memory_space<vmem>>, %arg6: memref<1x1x16xf32, #tpu.memory_space<vmem>>, %arg7: memref<1x256x16xbf16, #tpu.memory_space<vmem>>, %arg8: memref<256x16xf32, #tpu.memory_space<vmem>>) attributes {dimension_semantics = [#tpu.dimension_semantics<parallel>, #tpu.dimension_semantics<parallel>, #tpu.dimension_semantics<parallel>, #tpu.dimension_semantics<arbitrary>], iteration_bounds = array<i64: 1, 2, 1, 1>, scalar_prefetch = 0 : i64, scratch_operands = 1 : i64, tpu.core_type = #tpu.core_type<tc>, window_params = [{transform_indices = @transform_0, window_bounds = array<i64: 1, 256, 27>}, {transform_indices = @transform_1, window_bounds = array<i64: 1, 27, 16>}, {transform_indices = @transform_2, window_bounds = array<i64: 1, 1, 16>}, {transform_indices = @transform_3, window_bounds = array<i64: 1, 256, 16>}]} {
    %c0_i32 = arith.constant 0 : i32
    %0 = arith.cmpi eq, %arg3, %c0_i32 : i32
    %1 = arith.extui %0 : i1 to i32
    %c0_i32_0 = arith.constant 0 : i32
    %2 = arith.cmpi ne, %1, %c0_i32_0 : i32
    scf.if %2 {
      %cst_12 = arith.constant 0.000000e+00 : f32
      %15 = vector.broadcast %cst_12 : f32 to vector<256x16xf32>
      %c0_13 = arith.constant 0 : index
      %c0_14 = arith.constant 0 : index
      %16 = vector.load %arg8[%c0_13, %c0_14] : memref<256x16xf32, #tpu.memory_space<vmem>>, vector<256x16xf32>
      tpu.vector_store %arg8[%c0_13, %c0_14], %15 {strides = array<i32>} : memref<256x16xf32, #tpu.memory_space<vmem>>, vector<256x16xf32>,
    } else {
    }
    %c0 = arith.constant 0 : index
    %c0_1 = arith.constant 0 : index
    %3 = vector.load %arg8[%c0, %c0_1] : memref<256x16xf32, #tpu.memory_space<vmem>>, vector<256x16xf32>
    %c0_2 = arith.constant 0 : index
    %c0_3 = arith.constant 0 : index
    %c0_4 = arith.constant 0 : index
    %4 = vector.load %arg4[%c0_2, %c0_3, %c0_4] : memref<1x256x27xbf16, #tpu.memory_space<vmem>>, vector<1x256x27xbf16>
    %5 = vector.shape_cast %4 : vector<1x256x27xbf16> to vector<256x27xbf16>
    %c0_5 = arith.constant 0 : index
    %c0_6 = arith.constant 0 : index
    %c0_7 = arith.constant 0 : index
    %6 = vector.load %arg5[%c0_5, %c0_6, %c0_7] : memref<1x27x16xf32, #tpu.memory_space<vmem>>, vector<1x27x16xf32>
    %7 = vector.shape_cast %6 : vector<1x27x16xf32> to vector<27x16xf32>
    %8 = arith.truncf %7 : vector<27x16xf32> to vector<27x16xbf16>
    %cst = arith.constant dense<0.000000e+00> : vector<256x16xf32>
    %9 = tpu.matmul %5, %8, %cst {dimension_numbers = #tpu.dot_dimension_numbers<[1], [0], [0], [1], [0, 0, 1, 1], [], []>} : vector<256x27xbf16>, vector<27x16xbf16>, vector<256x16xf32> -> vector<256x16xf32>
    %10 = arith.addf %3, %9 : vector<256x16xf32>
    %c0_8 = arith.constant 0 : index
    %c0_9 = arith.constant 0 : index
    %11 = vector.load %arg8[%c0_8, %c0_9] : memref<256x16xf32, #tpu.memory_space<vmem>>, vector<256x16xf32>
    tpu.vector_store %arg8[%c0_8, %c0_9], %10 {strides = array<i32>} : memref<256x16xf32, #tpu.memory_space<vmem>>, vector<256x16xf32>,
    %c0_i32_10 = arith.constant 0 : i32
    %12 = arith.cmpi eq, %arg3, %c0_i32_10 : i32
    %13 = arith.extui %12 : i1 to i32
    %c0_i32_11 = arith.constant 0 : i32
    %14 = arith.cmpi ne, %13, %c0_i32_11 : i32
    scf.if %14 {
      %c0_12 = arith.constant 0 : index
      %c0_13 = arith.constant 0 : index
      %15 = vector.load %arg8[%c0_12, %c0_13] : memref<256x16xf32, #tpu.memory_space<vmem>>, vector<256x16xf32>
      %c0_14 = arith.constant 0 : index
      %c0_15 = arith.constant 0 : index
      %c0_16 = arith.constant 0 : index
      %16 = vector.load %arg6[%c0_14, %c0_15, %c0_16] : memref<1x1x16xf32, #tpu.memory_space<vmem>>, vector<1x1x16xf32>
      %17 = vector.shape_cast %16 : vector<1x1x16xf32> to vector<1x16xf32>
      %18 = vector.broadcast %17 : vector<1x16xf32> to vector<256x16xf32>
      %19 = arith.addf %15, %18 : vector<256x16xf32>
      %20 = arith.truncf %19 : vector<256x16xf32> to vector<256x16xbf16>
      %c0_17 = arith.constant 0 : index
      %c0_18 = arith.constant 0 : index
      %c0_19 = arith.constant 0 : index
      %21 = vector.load %arg7[%c0_17, %c0_18, %c0_19] : memref<1x256x16xbf16, #tpu.memory_space<vmem>>, vector<1x256x16xbf16>
      %22 = vector.shape_cast %21 : vector<1x256x16xbf16> to vector<256x16xbf16>
      %23 = vector.shape_cast %20 : vector<256x16xbf16> to vector<1x256x16xbf16>
      tpu.vector_store %arg7[%c0_17, %c0_18, %c0_19], %23 {strides = array<i32>} : memref<1x256x16xbf16, #tpu.memory_space<vmem>>, vector<1x256x16xbf16>,
    } else {
    }
    return
  }
  func.func @transform_0(%arg0: i32, %arg1: i32, %arg2: i32, %arg3: i32) -> (i32, i32, i32) {
    %c0_i32 = arith.constant 0 : i32
    %c0_i32_0 = arith.constant 0 : i32
    return %c0_i32, %arg1, %arg3 : i32, i32, i32
  }
  func.func @transform_1(%arg0: i32, %arg1: i32, %arg2: i32, %arg3: i32) -> (i32, i32, i32) {
    %c0_i32 = arith.constant 0 : i32
    %c0_i32_0 = arith.constant 0 : i32
    return %c0_i32, %arg3, %arg2 : i32, i32, i32
  }
  func.func @transform_2(%arg0: i32, %arg1: i32, %arg2: i32, %arg3: i32) -> (i32, i32, i32) {
    %c0_i32 = arith.constant 0 : i32
    %c0_i32_0 = arith.constant 0 : i32
    %c0_i32_1 = arith.constant 0 : i32
    return %c0_i32, %c0_i32_0, %arg2 : i32, i32, i32
  }
  func.func @transform_3(%arg0: i32, %arg1: i32, %arg2: i32, %arg3: i32) -> (i32, i32, i32) {
    %c0_i32 = arith.constant 0 : i32
    return %arg0, %arg1, %arg2 : i32, i32, i32
  }
}

</mosaic_0001>

<bundles_post_ra>
// kernel: tpu_custom_call.1
= control target key start
LH: loop header
LB: loop body
LE: loop exit
PB: predicated region body
PF: predicated region fallthrough
CT: control target
= control target key end

     0   :  { %s1128_s12 = smov 0   ;;  %s1130_s13 = smov 0   ;;  %s1381_s0 = inlined_call_operand.vmem [shape: bf16[1,512,27], index: 0, kind: input, shape index: {}]   ;;  %s1382_s1 = inlined_call_operand.vmem [shape: f32[1,27,16], index: 1, kind: input, shape index: {}]   ;;  %s1383_s2 = inlined_call_operand.vmem [shape: f32[1,1,16], index: 2, kind: input, shape index: {}]   ;;  %s1384_s3 = inlined_call_operand.vmem [shape: bf16[1,512,16], index: 3, kind: output, shape index: {}]  }
   0x1   :  { %s1132_s14 = smov 0  }
   0x2 LB: > { %s35_s15 = sadd.s32 1, %s1100_s13  ;;  %p946_p0 = scmp.ge.s32.totalorder %s1104_s14, 1  ;;  %s1104_s14 = sphi %s1132_s14, %s13_s14   ;;  %s1100_s13 = sphi %s1130_s13, %s1386_s13   ;;  %s1096_s12 = sphi %s1128_s12, %s1385_s12  }
   0x3   : > { %p37_p1 = scmp.ge.s32.totalorder %s35_s15, 2  ;;  %p197_p2 = scmp.lt.s32.totalorder %s1104_s14, 3 }
   0x5   : > { %s1388_s15 = smov (%p37_p1, %s35_s15), 0  ;;  %p198_p3 = pnand %p946_p0, %p197_p2 }
   0x6   : > { %s947_s20 = sshll.u32 (!%p198_p3), %s1096_s12, 5 }
   0x7   : > { %201 = sbr.rel (%p198_p3) target bundleno = 229 (0xe5), region = 32  ;;  %p243_p4 = scmp.lt.s32.totalorder (!%p198_p3), %s947_s20, 63 }
   0xc   : > { %v380_v0 = vld [vmem:[%s1382_s1 + $0x10] sm:$0xff]  ;;  %v381_v1 = vld [vmem:[%s1382_s1 + $0x18] sm:$0x7]  ;;  %vm513_vm0 = vcmask 1044480   ;;  %vm514_vm1 = vcmask 1045504   ;;  %v1106_v3 = vmov 65535  }
   0xd   : > { %v383_v2 = vpack.c.bf16 %v381_v1, %v380_v0  ;;  %v515_v4 = vsel %vm513_vm0, 4294967295, %v1106_v3  ;;  %v378_v6 = vld [vmem:[%s1382_s1] sm:$0xff]  ;;  %v379_v7 = vld [vmem:[%s1382_s1 + $0x8] sm:$0xff]  ;;  %s1390_s20 = smov (!%p243_p4, %s947_s20), 63  ;;  %vm464_vm2 = vcmask 220160   ;;  %vm281_vm3 = vcmask 130048  }
   0xe   : > { %v516_v5 = vsel %vm514_vm1, %v515_v4, 0  ;;  %v382_v9 = vpack.c.bf16 %v379_v7, %v378_v6  ;;  %s948_s25 = sshll.u32 %s1390_s20, 2  ;;  %v1107_v18 = vmov 0.0   ;;  %v1237_v37 = vld [vmem:[%s1383_s2] ss:$0 sm:$0xff]  ;;  %vm777_vm4 = vcmask 125952  }
   0xf   : > { %v518_v8 = vand.u32 %v516_v5, %v383_v2  ;;  %s1166_s28 = scalar_lea.vmem %s1381_s0, %s948_s25  ;;  %282 = vst.msk [vmem:[#allocation2] sm:$0xff] %vm281_vm3, %v1107_v18  ;;  %s1247_s6 = scalar_lea.vmem %s1384_s3, %s948_s25 }
  0x10   : > { %v1033_v10 = vld [vmem:[%s1166_s28] sm:$0xff]  ;;  %v1034_v14 = vld [vmem:[%s1166_s28 + $0x8] sm:$0xff]  ;;  %283 = vst.msk [vmem:[#allocation2 + $0x8] sm:$0xff] %vm281_vm3, %v1107_v18  ;;  %v1035_v19 = vld [vmem:[%s1166_s28 + $0x10] sm:$0xff] }
  0x11   : > { %526 = vmatpush.bf16.msra.mxu0 %v518_v8  ;;  %1049 = vmatpush.bf16.msra.mxu1 %v518_v8  ;;  %v1037_v11 = vld [vmem:[%s1166_s28 + $0x20] sm:$0xff]  ;;  %v1038_v15 = vld [vmem:[%s1166_s28 + $0x28] sm:$0xff]  ;;  %284 = vst.msk [vmem:[#allocation2 + $0x10] sm:$0xff] %vm281_vm3, %v1107_v18  ;;  %v1039_v20 = vld [vmem:[%s1166_s28 + $0x30] sm:$0xff] }
  0x12   : > { %1050 = vmatpush.bf16.msra.mxu2 %v518_v8  ;;  %1051 = vmatpush.bf16.msra.mxu3 %v518_v8  ;;  %v1041_v12 = vld [vmem:[%s1166_s28 + $0x40] sm:$0xff]  ;;  %v1042_v16 = vld [vmem:[%s1166_s28 + $0x48] sm:$0xff]  ;;  %285 = vst.msk [vmem:[#allocation2 + $0x18] sm:$0xff] %vm281_vm3, %v1107_v18  ;;  %v1043_v21 = vld [vmem:[%s1166_s28 + $0x50] sm:$0xff] }
  0x13   : > { %v1045_v13 = vld [vmem:[%s1166_s28 + $0x60] sm:$0xff]  ;;  %v1046_v17 = vld [vmem:[%s1166_s28 + $0x68] sm:$0xff]  ;;  %286 = vst.msk [vmem:[#allocation2 + $0x20] sm:$0xff] %vm281_vm3, %v1107_v18  ;;  %v1047_v22 = vld [vmem:[%s1166_s28 + $0x70] sm:$0xff] }
  0x14   : > { %287 = vst.msk [vmem:[#allocation2 + $0x28] sm:$0xff] %vm281_vm3, %v1107_v18  ;;  %v1036_v23 = vld [vmem:[%s1166_s28 + $0x18] sm:$0xff] }
  0x15   : > { %527 = vmatpush.bf16.msra.mxu0 %v382_v9  ;;  %1052 = vmatpush.bf16.msra.mxu1 %v382_v9  ;;  %288 = vst.msk [vmem:[#allocation2 + $0x30] sm:$0xff] %vm281_vm3, %v1107_v18  ;;  %v1040_v24 = vld [vmem:[%s1166_s28 + $0x38] sm:$0xff] }
  0x16   : > { %1053 = vmatpush.bf16.msra.mxu2 %v382_v9  ;;  %1054 = vmatpush.bf16.msra.mxu3 %v382_v9  ;;  %289 = vst.msk [vmem:[#allocation2 + $0x38] sm:$0xff] %vm281_vm3, %v1107_v18  ;;  %v1044_v25 = vld [vmem:[%s1166_s28 + $0x58] sm:$0xff]  ;;  %v314_v27 = vld [vmem:[#allocation2] sm:$0xff] }
  0x17   : > { %290 = vst.msk [vmem:[#allocation2 + $0x40] sm:$0xff] %vm281_vm3, %v1107_v18  ;;  %v1048_v26 = vld [vmem:[%s1166_s28 + $0x78] sm:$0xff]  ;;  %v315_v35 = vld [vmem:[#allocation2 + $0x8] sm:$0xff] }
  0x18   : > { %1015 = vmatmul.msk.bf16.vlgmr.msra.gmra.mxu0 %vm464_vm2, %v1033_v10  ;;  %1019 = vmatmul.msk.bf16.vlgmr.msra.gmra.mxu1 %vm464_vm2, %v1037_v11  ;;  %291 = vst.msk [vmem:[#allocation2 + $0x48] sm:$0xff] %vm281_vm3, %v1107_v18  ;;  %v316_v54 = vld [vmem:[#allocation2 + $0x10] sm:$0xff] }
  0x19   : > { %1023 = vmatmul.msk.bf16.vlgmr.msra.gmra.mxu2 %vm464_vm2, %v1041_v12  ;;  %1027 = vmatmul.msk.bf16.vlgmr.msra.gmra.mxu3 %vm464_vm2, %v1045_v13  ;;  %292 = vst.msk [vmem:[#allocation2 + $0x50] sm:$0xff] %vm281_vm3, %v1107_v18  ;;  %v317_v13 = vld [vmem:[#allocation2 + $0x18] sm:$0xff] }
  0x1a   : > { %293 = vst.msk [vmem:[#allocation2 + $0x58] sm:$0xff] %vm281_vm3, %v1107_v18 }
  0x1b   : > { %294 = vst.msk [vmem:[#allocation2 + $0x60] sm:$0xff] %vm281_vm3, %v1107_v18 }
  0x1c   : > { %295 = vst.msk [vmem:[#allocation2 + $0x68] sm:$0xff] %vm281_vm3, %v1107_v18 }
  0x1d   : > { %296 = vst.msk [vmem:[#allocation2 + $0x70] sm:$0xff] %vm281_vm3, %v1107_v18 }
  0x1e   : > { %297 = vst.msk [vmem:[#allocation2 + $0x78] sm:$0xff] %vm281_vm3, %v1107_v18  ;;  %v322_v28 = vld [vmem:[#allocation2 + $0x40] sm:$0xff] }
  0x1f   : > { %298 = vst.msk [vmem:[#allocation2 + $0x80] sm:$0xff] %vm281_vm3, %v1107_v18  ;;  %v323_v36 = vld [vmem:[#allocation2 + $0x48] sm:$0xff] }
  0x20   : > { %299 = vst.msk [vmem:[#allocation2 + $0x88] sm:$0xff] %vm281_vm3, %v1107_v18  ;;  %v324_v55 = vld [vmem:[#allocation2 + $0x50] sm:$0xff] }
  0x21   : > { %300 = vst.msk [vmem:[#allocation2 + $0x90] sm:$0xff] %vm281_vm3, %v1107_v18 }
  0x22   : > { %301 = vst.msk [vmem:[#allocation2 + $0x98] sm:$0xff] %vm281_vm3, %v1107_v18 }
  0x23   : > { %302 = vst.msk [vmem:[#allocation2 + $0xa0] sm:$0xff] %vm281_vm3, %v1107_v18 }
  0x24   : > { %303 = vst.msk [vmem:[#allocation2 + $0xa8] sm:$0xff] %vm281_vm3, %v1107_v18 }
  0x25   : > { %304 = vst.msk [vmem:[#allocation2 + $0xb0] sm:$0xff] %vm281_vm3, %v1107_v18 }
  0x26   : > { %305 = vst.msk [vmem:[#allocation2 + $0xb8] sm:$0xff] %vm281_vm3, %v1107_v18  ;;  %v330_v33 = vld [vmem:[#allocation2 + $0x80] sm:$0xff] }
  0x27   : > { %306 = vst.msk [vmem:[#allocation2 + $0xc0] sm:$0xff] %vm281_vm3, %v1107_v18  ;;  %v331_v51 = vld [vmem:[#allocation2 + $0x88] sm:$0xff] }
  0x28   : > { %1016 = vmatmul.msk.bf16.gmra.mxu0 %vm464_vm2, %v1034_v14  ;;  %1020 = vmatmul.msk.bf16.gmra.mxu1 %vm464_vm2, %v1038_v15  ;;  %307 = vst.msk [vmem:[#allocation2 + $0xc8] sm:$0xff] %vm281_vm3, %v1107_v18  ;;  %v332_v10 = vld [vmem:[#allocation2 + $0x90] sm:$0xff]  ;;  %v325_v14 = vld [vmem:[#allocation2 + $0x58] sm:$0xff] }
  0x29   : > { %1024 = vmatmul.msk.bf16.gmra.mxu2 %vm464_vm2, %v1042_v16  ;;  %1028 = vmatmul.msk.bf16.gmra.mxu3 %vm464_vm2, %v1046_v17  ;;  %308 = vst.msk [vmem:[#allocation2 + $0xd0] sm:$0xff] %vm281_vm3, %v1107_v18 }
  0x2a   : > { %309 = vst.msk [vmem:[#allocation2 + $0xd8] sm:$0xff] %vm281_vm3, %v1107_v18 }
  0x2b   : > { %310 = vst.msk [vmem:[#allocation2 + $0xe0] sm:$0xff] %vm281_vm3, %v1107_v18 }
  0x2c   : > { %311 = vst.msk [vmem:[#allocation2 + $0xe8] sm:$0xff] %vm281_vm3, %v1107_v18 }
  0x2d   : > { %312 = vst.msk [vmem:[#allocation2 + $0xf0] sm:$0xff] %vm281_vm3, %v1107_v18 }
  0x2e   : > { %313 = vst.msk [vmem:[#allocation2 + $0xf8] sm:$0xff] %vm281_vm3, %v1107_v18  ;;  %v338_v34 = vld [vmem:[#allocation2 + $0xc0] sm:$0xff] }
  0x2f   : > { %v339_v52 = vld [vmem:[#allocation2 + $0xc8] sm:$0xff] }
  0x30   : > { %v340_v11 = vld [vmem:[#allocation2 + $0xd0] sm:$0xff] }
  0x38   : > { %1017 = vmatmul.msk.bf16.gmra.mxu0 %vm464_vm2, %v1035_v19  ;;  %1021 = vmatmul.msk.bf16.gmra.mxu1 %vm464_vm2, %v1039_v20 }
  0x39   : > { %1025 = vmatmul.msk.bf16.gmra.mxu2 %vm464_vm2, %v1043_v21  ;;  %1029 = vmatmul.msk.bf16.gmra.mxu3 %vm464_vm2, %v1047_v22 }
  0x48   : > { %1018 = vmatmul.msk.bf16.gmra.mxu0 %vm464_vm2, %v1036_v23  ;;  %1022 = vmatmul.msk.bf16.gmra.mxu1 %vm464_vm2, %v1040_v24 }
  0x49   : > { %1026 = vmatmul.msk.bf16.gmra.mxu2 %vm464_vm2, %v1044_v25  ;;  %1030 = vmatmul.msk.bf16.gmra.mxu3 %vm464_vm2, %v1048_v26 }
  0x95   : > { %v529_v29 = vpop.f32.mrf.mxu0  ;;  %v549_v30 = vpop.f32.mrf.mxu1 }
  0x96   : > { %v609_v31 = vadd.f32 %v529_v29, %v314_v27  ;;  %v617_v32 = vadd.f32 %v549_v30, %v322_v28 }
  0x98   : > { %642 = vst.msk [vmem:[#allocation2] sm:$0xff] %vm281_vm3, %v609_v31 }
  0x99   : > { %650 = vst.msk [vmem:[#allocation2 + $0x40] sm:$0xff] %vm281_vm3, %v617_v32 }
  0x9c   : > { %v569_v38 = vpop.f32.mrf.mxu2  ;;  %v589_v39 = vpop.f32.mrf.mxu3 }
  0x9d   : > { %v625_v40 = vadd.f32 %v569_v38, %v330_v33  ;;  %v633_v41 = vadd.f32 %v589_v39, %v338_v34  ;;  %v531_v42 = vpop.f32.mrf.mxu0  ;;  %v551_v43 = vpop.f32.mrf.mxu1  ;;  %v333_v34 = vld [vmem:[#allocation2 + $0x98] sm:$0xff]  ;;  %v318_v38 = vld [vmem:[#allocation2 + $0x20] sm:$0xff] }
  0x9e   : > { %v610_v44 = vadd.f32 %v531_v42, %v315_v35  ;;  %v618_v45 = vadd.f32 %v551_v43, %v323_v36  ;;  %v341_v35 = vld [vmem:[#allocation2 + $0xd8] sm:$0xff]  ;;  %v326_v39 = vld [vmem:[#allocation2 + $0x60] sm:$0xff] }
  0x9f   : > { %v677_v46 = vld [vmem:[#allocation2] sm:$0xff]  ;;  %658 = vst.msk [vmem:[#allocation2 + $0x80] sm:$0xff] %vm281_vm3, %v625_v40 }
  0xa0   : > { %v713_v47 = vadd.f32 %v1237_v37, %v677_v46  ;;  %v685_v48 = vld [vmem:[#allocation2 + $0x40] sm:$0xff]  ;;  %666 = vst.msk [vmem:[#allocation2 + $0xc0] sm:$0xff] %vm281_vm3, %v633_v41 }
  0xa1   : > { %v721_v49 = vadd.f32 %v1237_v37, %v685_v48  ;;  %643 = vst.msk [vmem:[#allocation2 + $0x8] sm:$0xff] %vm281_vm3, %v610_v44 }
  0xa2   : > { %v745_v50 = vpack.c.bf16 %v713_v47, %v713_v47  ;;  %651 = vst.msk [vmem:[#allocation2 + $0x48] sm:$0xff] %vm281_vm3, %v618_v45 }
  0xa3   : > { %v753_v53 = vpack.c.bf16 %v721_v49, %v721_v49 }
  0xa4   : > { %778 = vst.msk [vmem:[%s1247_s6] sm:$0xf] %vm777_vm4, %v745_v50  ;;  %v571_v56 = vpop.f32.mrf.mxu2  ;;  %v591_v57 = vpop.f32.mrf.mxu3 }
  0xa5   : > { %786 = vst.msk [vmem:[%s1247_s6 + $0x20] sm:$0xf] %vm777_vm4, %v753_v53  ;;  %v626_v58 = vadd.f32 %v571_v56, %v331_v51  ;;  %v634_v59 = vadd.f32 %v591_v57, %v339_v52  ;;  %v534_v60 = vpop.f32.mrf.mxu0  ;;  %v554_v61 = vpop.f32.mrf.mxu1 }
  0xa6   : > { %v693_v62 = vld [vmem:[#allocation2 + $0x80] sm:$0xff]  ;;  %v611_v63 = vadd.f32 %v534_v60, %v316_v54  ;;  %v619_v0 = vadd.f32 %v554_v61, %v324_v55 }
  0xa7   : > { %v729_v1 = vadd.f32 %v1237_v37, %v693_v62  ;;  %v701_v2 = vld [vmem:[#allocation2 + $0xc0] sm:$0xff]  ;;  %659 = vst.msk [vmem:[#allocation2 + $0x88] sm:$0xff] %vm281_vm3, %v626_v58  ;;  %v319_v62 = vld [vmem:[#allocation2 + $0x28] sm:$0xff] }
  0xa8   : > { %v737_v3 = vadd.f32 %v1237_v37, %v701_v2  ;;  %v678_v4 = vld [vmem:[#allocation2 + $0x8] sm:$0xff]  ;;  %667 = vst.msk [vmem:[#allocation2 + $0xc8] sm:$0xff] %vm281_vm3, %v634_v59  ;;  %v334_v59 = vld [vmem:[#allocation2 + $0xa0] sm:$0xff] }
  0xa9   : > { %v761_v5 = vpack.c.bf16 %v729_v1, %v729_v1  ;;  %v714_v6 = vadd.f32 %v1237_v37, %v678_v4  ;;  %v686_v7 = vld [vmem:[#allocation2 + $0x48] sm:$0xff]  ;;  %644 = vst.msk [vmem:[#allocation2 + $0x10] sm:$0xff] %vm281_vm3, %v611_v63  ;;  %v342_v60 = vld [vmem:[#allocation2 + $0xe0] sm:$0xff] }
  0xaa   : > { %v769_v8 = vpack.c.bf16 %v737_v3, %v737_v3  ;;  %v722_v9 = vadd.f32 %v1237_v37, %v686_v7  ;;  %652 = vst.msk [vmem:[#allocation2 + $0x50] sm:$0xff] %vm281_vm3, %v619_v0  ;;  %v327_v63 = vld [vmem:[#allocation2 + $0x68] sm:$0xff] }
  0xab   : > { %794 = vst.msk [vmem:[%s1247_s6 + $0x40] sm:$0xf] %vm777_vm4, %v761_v5  ;;  %v746_v12 = vpack.c.bf16 %v714_v6, %v714_v6 }
  0xac   : > { %802 = vst.msk [vmem:[%s1247_s6 + $0x60] sm:$0xf] %vm777_vm4, %v769_v8  ;;  %v754_v15 = vpack.c.bf16 %v722_v9, %v722_v9  ;;  %v574_v16 = vpop.f32.mrf.mxu2  ;;  %v594_v17 = vpop.f32.mrf.mxu3 }
  0xad   : > { %779 = vst.msk [vmem:[%s1247_s6 + $0x4] sm:$0xf] %vm777_vm4, %v746_v12  ;;  %v627_v18 = vadd.f32 %v574_v16, %v332_v10  ;;  %v635_v19 = vadd.f32 %v594_v17, %v340_v11  ;;  %v536_v20 = vpop.f32.mrf.mxu0  ;;  %v556_v21 = vpop.f32.mrf.mxu1 }
  0xae   : > { %787 = vst.msk [vmem:[%s1247_s6 + $0x24] sm:$0xf] %vm777_vm4, %v754_v15  ;;  %v694_v22 = vld [vmem:[#allocation2 + $0x88] sm:$0xff]  ;;  %v612_v23 = vadd.f32 %v536_v20, %v317_v13  ;;  %v620_v24 = vadd.f32 %v556_v21, %v325_v14 }
  0xaf   : > { %v730_v25 = vadd.f32 %v1237_v37, %v694_v22  ;;  %v702_v26 = vld [vmem:[#allocation2 + $0xc8] sm:$0xff]  ;;  %660 = vst.msk [vmem:[#allocation2 + $0x90] sm:$0xff] %vm281_vm3, %v627_v18  ;;  %v320_v22 = vld [vmem:[#allocation2 + $0x30] sm:$0xff] }
  0xb0   : > { %v738_v27 = vadd.f32 %v1237_v37, %v702_v26  ;;  %v679_v28 = vld [vmem:[#allocation2 + $0x10] sm:$0xff]  ;;  %668 = vst.msk [vmem:[#allocation2 + $0xd0] sm:$0xff] %vm281_vm3, %v635_v19  ;;  %v335_v19 = vld [vmem:[#allocation2 + $0xa8] sm:$0xff] }
  0xb1   : > { %v762_v29 = vpack.c.bf16 %v730_v25, %v730_v25  ;;  %v715_v30 = vadd.f32 %v1237_v37, %v679_v28  ;;  %v687_v31 = vld [vmem:[#allocation2 + $0x50] sm:$0xff]  ;;  %645 = vst.msk [vmem:[#allocation2 + $0x18] sm:$0xff] %vm281_vm3, %v612_v23  ;;  %v343_v20 = vld [vmem:[#allocation2 + $0xe8] sm:$0xff] }
  0xb2   : > { %v770_v32 = vpack.c.bf16 %v738_v27, %v738_v27  ;;  %v723_v33 = vadd.f32 %v1237_v37, %v687_v31  ;;  %653 = vst.msk [vmem:[#allocation2 + $0x58] sm:$0xff] %vm281_vm3, %v620_v24  ;;  %v328_v23 = vld [vmem:[#allocation2 + $0x70] sm:$0xff] }
  0xb3   : > { %795 = vst.msk [vmem:[%s1247_s6 + $0x44] sm:$0xf] %vm777_vm4, %v762_v29  ;;  %v747_v36 = vpack.c.bf16 %v715_v30, %v715_v30 }
  0xb4   : > { %803 = vst.msk [vmem:[%s1247_s6 + $0x64] sm:$0xf] %vm777_vm4, %v770_v32  ;;  %v755_v40 = vpack.c.bf16 %v723_v33, %v723_v33  ;;  %v576_v41 = vpop.f32.mrf.mxu2  ;;  %v596_v42 = vpop.f32.mrf.mxu3 }
  0xb5   : > { %780 = vst.msk [vmem:[%s1247_s6 + $0x8] sm:$0xf] %vm777_vm4, %v747_v36  ;;  %v628_v43 = vadd.f32 %v576_v41, %v333_v34  ;;  %v636_v44 = vadd.f32 %v596_v42, %v341_v35  ;;  %v539_v45 = vpop.f32.mrf.mxu0  ;;  %v559_v46 = vpop.f32.mrf.mxu1 }
  0xb6   : > { %788 = vst.msk [vmem:[%s1247_s6 + $0x28] sm:$0xf] %vm777_vm4, %v755_v40  ;;  %v695_v47 = vld [vmem:[#allocation2 + $0x90] sm:$0xff]  ;;  %v613_v48 = vadd.f32 %v539_v45, %v318_v38  ;;  %v621_v49 = vadd.f32 %v559_v46, %v326_v39 }
  0xb7   : > { %v731_v50 = vadd.f32 %v1237_v37, %v695_v47  ;;  %v703_v51 = vld [vmem:[#allocation2 + $0xd0] sm:$0xff]  ;;  %661 = vst.msk [vmem:[#allocation2 + $0x98] sm:$0xff] %vm281_vm3, %v628_v43  ;;  %v321_v47 = vld [vmem:[#allocation2 + $0x38] sm:$0xff] }
  0xb8   : > { %v739_v52 = vadd.f32 %v1237_v37, %v703_v51  ;;  %v680_v53 = vld [vmem:[#allocation2 + $0x18] sm:$0xff]  ;;  %669 = vst.msk [vmem:[#allocation2 + $0xd8] sm:$0xff] %vm281_vm3, %v636_v44  ;;  %v336_v44 = vld [vmem:[#allocation2 + $0xb0] sm:$0xff] }
  0xb9   : > { %v763_v54 = vpack.c.bf16 %v731_v50, %v731_v50  ;;  %v716_v55 = vadd.f32 %v1237_v37, %v680_v53  ;;  %v688_v56 = vld [vmem:[#allocation2 + $0x58] sm:$0xff]  ;;  %646 = vst.msk [vmem:[#allocation2 + $0x20] sm:$0xff] %vm281_vm3, %v613_v48  ;;  %v344_v45 = vld [vmem:[#allocation2 + $0xf0] sm:$0xff] }
  0xba   : > { %v771_v57 = vpack.c.bf16 %v739_v52, %v739_v52  ;;  %v724_v58 = vadd.f32 %v1237_v37, %v688_v56  ;;  %654 = vst.msk [vmem:[#allocation2 + $0x60] sm:$0xff] %vm281_vm3, %v621_v49  ;;  %v329_v48 = vld [vmem:[#allocation2 + $0x78] sm:$0xff] }
  0xbb   : > { %796 = vst.msk [vmem:[%s1247_s6 + $0x48] sm:$0xf] %vm777_vm4, %v763_v54  ;;  %v748_v61 = vpack.c.bf16 %v716_v55, %v716_v55 }
  0xbc   : > { %804 = vst.msk [vmem:[%s1247_s6 + $0x68] sm:$0xf] %vm777_vm4, %v771_v57  ;;  %v756_v0 = vpack.c.bf16 %v724_v58, %v724_v58  ;;  %v579_v1 = vpop.f32.mrf.mxu2  ;;  %v599_v2 = vpop.f32.mrf.mxu3 }
  0xbd   : > { %781 = vst.msk [vmem:[%s1247_s6 + $0xc] sm:$0xf] %vm777_vm4, %v748_v61  ;;  %v629_v3 = vadd.f32 %v579_v1, %v334_v59  ;;  %v637_v4 = vadd.f32 %v599_v2, %v342_v60  ;;  %v541_v5 = vpop.f32.mrf.mxu0  ;;  %v561_v6 = vpop.f32.mrf.mxu1 }
  0xbe   : > { %789 = vst.msk [vmem:[%s1247_s6 + $0x2c] sm:$0xf] %vm777_vm4, %v756_v0  ;;  %v696_v7 = vld [vmem:[#allocation2 + $0x98] sm:$0xff]  ;;  %v614_v8 = vadd.f32 %v541_v5, %v319_v62  ;;  %v622_v9 = vadd.f32 %v561_v6, %v327_v63 }
  0xbf   : > { %v732_v10 = vadd.f32 %v1237_v37, %v696_v7  ;;  %v704_v11 = vld [vmem:[#allocation2 + $0xd8] sm:$0xff]  ;;  %662 = vst.msk [vmem:[#allocation2 + $0xa0] sm:$0xff] %vm281_vm3, %v629_v3 }
  0xc0   : > { %v740_v12 = vadd.f32 %v1237_v37, %v704_v11  ;;  %v681_v13 = vld [vmem:[#allocation2 + $0x20] sm:$0xff]  ;;  %670 = vst.msk [vmem:[#allocation2 + $0xe0] sm:$0xff] %vm281_vm3, %v637_v4  ;;  %v337_v4 = vld [vmem:[#allocation2 + $0xb8] sm:$0xff] }
  0xc1   : > { %v764_v14 = vpack.c.bf16 %v732_v10, %v732_v10  ;;  %v717_v15 = vadd.f32 %v1237_v37, %v681_v13  ;;  %v689_v16 = vld [vmem:[#allocation2 + $0x60] sm:$0xff]  ;;  %647 = vst.msk [vmem:[#allocation2 + $0x28] sm:$0xff] %vm281_vm3, %v614_v8  ;;  %v345_v5 = vld [vmem:[#allocation2 + $0xf8] sm:$0xff] }
  0xc2   : > { %v772_v17 = vpack.c.bf16 %v740_v12, %v740_v12  ;;  %v725_v18 = vadd.f32 %v1237_v37, %v689_v16  ;;  %655 = vst.msk [vmem:[#allocation2 + $0x68] sm:$0xff] %vm281_vm3, %v622_v9 }
  0xc3   : > { %797 = vst.msk [vmem:[%s1247_s6 + $0x4c] sm:$0xf] %vm777_vm4, %v764_v14  ;;  %v749_v21 = vpack.c.bf16 %v717_v15, %v717_v15 }
  0xc4   : > { %805 = vst.msk [vmem:[%s1247_s6 + $0x6c] sm:$0xf] %vm777_vm4, %v772_v17  ;;  %v757_v24 = vpack.c.bf16 %v725_v18, %v725_v18  ;;  %v581_v25 = vpop.f32.mrf.mxu2  ;;  %v601_v26 = vpop.f32.mrf.mxu3 }
  0xc5   : > { %782 = vst.msk [vmem:[%s1247_s6 + $0x10] sm:$0xf] %vm777_vm4, %v749_v21  ;;  %v630_v27 = vadd.f32 %v581_v25, %v335_v19  ;;  %v638_v28 = vadd.f32 %v601_v26, %v343_v20  ;;  %v544_v29 = vpop.f32.mrf.mxu0  ;;  %v564_v30 = vpop.f32.mrf.mxu1 }
  0xc6   : > { %790 = vst.msk [vmem:[%s1247_s6 + $0x30] sm:$0xf] %vm777_vm4, %v757_v24  ;;  %v697_v31 = vld [vmem:[#allocation2 + $0xa0] sm:$0xff]  ;;  %v615_v32 = vadd.f32 %v544_v29, %v320_v22  ;;  %v623_v33 = vadd.f32 %v564_v30, %v328_v23 }
  0xc7   : > { %v733_v34 = vadd.f32 %v1237_v37, %v697_v31  ;;  %v705_v35 = vld [vmem:[#allocation2 + $0xe0] sm:$0xff]  ;;  %663 = vst.msk [vmem:[#allocation2 + $0xa8] sm:$0xff] %vm281_vm3, %v630_v27 }
  0xc8   : > { %v741_v36 = vadd.f32 %v1237_v37, %v705_v35  ;;  %v682_v38 = vld [vmem:[#allocation2 + $0x28] sm:$0xff]  ;;  %671 = vst.msk [vmem:[#allocation2 + $0xe8] sm:$0xff] %vm281_vm3, %v638_v28 }
  0xc9   : > { %v765_v39 = vpack.c.bf16 %v733_v34, %v733_v34  ;;  %v718_v40 = vadd.f32 %v1237_v37, %v682_v38  ;;  %v690_v41 = vld [vmem:[#allocation2 + $0x68] sm:$0xff]  ;;  %648 = vst.msk [vmem:[#allocation2 + $0x30] sm:$0xff] %vm281_vm3, %v615_v32 }
  0xca   : > { %v773_v42 = vpack.c.bf16 %v741_v36, %v741_v36  ;;  %v726_v43 = vadd.f32 %v1237_v37, %v690_v41  ;;  %656 = vst.msk [vmem:[#allocation2 + $0x70] sm:$0xff] %vm281_vm3, %v623_v33 }
  0xcb   : > { %798 = vst.msk [vmem:[%s1247_s6 + $0x50] sm:$0xf] %vm777_vm4, %v765_v39  ;;  %v750_v46 = vpack.c.bf16 %v718_v40, %v718_v40 }
  0xcc   : > { %806 = vst.msk [vmem:[%s1247_s6 + $0x70] sm:$0xf] %vm777_vm4, %v773_v42  ;;  %v758_v49 = vpack.c.bf16 %v726_v43, %v726_v43  ;;  %v584_v50 = vpop.f32.mrf.mxu2  ;;  %v604_v51 = vpop.f32.mrf.mxu3 }
  0xcd   : > { %783 = vst.msk [vmem:[%s1247_s6 + $0x14] sm:$0xf] %vm777_vm4, %v750_v46  ;;  %v631_v52 = vadd.f32 %v584_v50, %v336_v44  ;;  %v639_v53 = vadd.f32 %v604_v51, %v344_v45  ;;  %v546_v54 = vpop.f32.mrf.mxu0  ;;  %v566_v55 = vpop.f32.mrf.mxu1 }
  0xce   : > { %791 = vst.msk [vmem:[%s1247_s6 + $0x34] sm:$0xf] %vm777_vm4, %v758_v49  ;;  %v698_v56 = vld [vmem:[#allocation2 + $0xa8] sm:$0xff]  ;;  %v616_v57 = vadd.f32 %v546_v54, %v321_v47  ;;  %v624_v58 = vadd.f32 %v566_v55, %v329_v48 }
  0xcf   : > { %v734_v59 = vadd.f32 %v1237_v37, %v698_v56  ;;  %v706_v60 = vld [vmem:[#allocation2 + $0xe8] sm:$0xff]  ;;  %664 = vst.msk [vmem:[#allocation2 + $0xb0] sm:$0xff] %vm281_vm3, %v631_v52 }
  0xd0   : > { %v742_v61 = vadd.f32 %v1237_v37, %v706_v60  ;;  %v683_v62 = vld [vmem:[#allocation2 + $0x30] sm:$0xff]  ;;  %672 = vst.msk [vmem:[#allocation2 + $0xf0] sm:$0xff] %vm281_vm3, %v639_v53 }
  0xd1   : > { %v766_v63 = vpack.c.bf16 %v734_v59, %v734_v59  ;;  %v719_v0 = vadd.f32 %v1237_v37, %v683_v62  ;;  %v691_v1 = vld [vmem:[#allocation2 + $0x70] sm:$0xff]  ;;  %649 = vst.msk [vmem:[#allocation2 + $0x38] sm:$0xff] %vm281_vm3, %v616_v57 }
  0xd2   : > { %v774_v2 = vpack.c.bf16 %v742_v61, %v742_v61  ;;  %v727_v3 = vadd.f32 %v1237_v37, %v691_v1  ;;  %657 = vst.msk [vmem:[#allocation2 + $0x78] sm:$0xff] %vm281_vm3, %v624_v58 }
  0xd3   : > { %799 = vst.msk [vmem:[%s1247_s6 + $0x54] sm:$0xf] %vm777_vm4, %v766_v63  ;;  %v751_v6 = vpack.c.bf16 %v719_v0, %v719_v0 }
  0xd4   : > { %807 = vst.msk [vmem:[%s1247_s6 + $0x74] sm:$0xf] %vm777_vm4, %v774_v2  ;;  %v759_v7 = vpack.c.bf16 %v727_v3, %v727_v3  ;;  %v586_v8 = vpop.f32.mrf.mxu2  ;;  %v606_v9 = vpop.f32.mrf.mxu3 }
  0xd5   : > { %784 = vst.msk [vmem:[%s1247_s6 + $0x18] sm:$0xf] %vm777_vm4, %v751_v6  ;;  %v632_v10 = vadd.f32 %v586_v8, %v337_v4  ;;  %v640_v11 = vadd.f32 %v606_v9, %v345_v5 }
  0xd6   : > { %792 = vst.msk [vmem:[%s1247_s6 + $0x38] sm:$0xf] %vm777_vm4, %v759_v7  ;;  %v699_v12 = vld [vmem:[#allocation2 + $0xb0] sm:$0xff] }
  0xd7   : > { %v735_v13 = vadd.f32 %v1237_v37, %v699_v12  ;;  %v707_v14 = vld [vmem:[#allocation2 + $0xf0] sm:$0xff]  ;;  %665 = vst.msk [vmem:[#allocation2 + $0xb8] sm:$0xff] %vm281_vm3, %v632_v10 }
  0xd8   : > { %v743_v15 = vadd.f32 %v1237_v37, %v707_v14  ;;  %v684_v16 = vld [vmem:[#allocation2 + $0x38] sm:$0xff]  ;;  %673 = vst.msk [vmem:[#allocation2 + $0xf8] sm:$0xff] %vm281_vm3, %v640_v11 }
  0xd9   : > { %v767_v17 = vpack.c.bf16 %v735_v13, %v735_v13  ;;  %v720_v18 = vadd.f32 %v1237_v37, %v684_v16  ;;  %v692_v19 = vld [vmem:[#allocation2 + $0x78] sm:$0xff] }
  0xda   : > { %v775_v20 = vpack.c.bf16 %v743_v15, %v743_v15  ;;  %v728_v21 = vadd.f32 %v1237_v37, %v692_v19 }
  0xdb   : > { %800 = vst.msk [vmem:[%s1247_s6 + $0x58] sm:$0xf] %vm777_vm4, %v767_v17  ;;  %v752_v22 = vpack.c.bf16 %v720_v18, %v720_v18 }
  0xdc   : > { %808 = vst.msk [vmem:[%s1247_s6 + $0x78] sm:$0xf] %vm777_vm4, %v775_v20  ;;  %v760_v23 = vpack.c.bf16 %v728_v21, %v728_v21 }
  0xdd   : > { %785 = vst.msk [vmem:[%s1247_s6 + $0x1c] sm:$0xf] %vm777_vm4, %v752_v22 }
  0xde   : > { %793 = vst.msk [vmem:[%s1247_s6 + $0x3c] sm:$0xf] %vm777_vm4, %v760_v23  ;;  %v700_v24 = vld [vmem:[#allocation2 + $0xb8] sm:$0xff] }
  0xdf   : > { %v736_v25 = vadd.f32 %v1237_v37, %v700_v24  ;;  %v708_v26 = vld [vmem:[#allocation2 + $0xf8] sm:$0xff] }
  0xe0   : > { %v744_v27 = vadd.f32 %v1237_v37, %v708_v26 }
  0xe1   : > { %v768_v28 = vpack.c.bf16 %v736_v25, %v736_v25 }
  0xe2   : > { %v776_v29 = vpack.c.bf16 %v744_v27, %v744_v27 }
  0xe3   : > { %801 = vst.msk [vmem:[%s1247_s6 + $0x5c] sm:$0xf] %vm777_vm4, %v768_v28 }
  0xe4   : > { %809 = vst.msk [vmem:[%s1247_s6 + $0x7c] sm:$0xf] %vm777_vm4, %v776_v29 }
  0xe5 PF: > { %s13_s14 = sadd.s32 1, %s1104_s14   ;;  %s1385_s12 = smov %s1100_s13 }
  0xe6   : > { %p10_p5 = scmp.ge.s32.totalorder %s13_s14, 4   ;;  %s1386_s13 = smov %s1388_s15 }
  0xe8   :  { %12 = sbr.rel (!%p10_p5) target bundleno = 2 (0x2), region = 76 }

</bundles_post_ra>
